<compile_context>
chip_gen: v7x
topology: tpu7x:2x2x1
jax: 0.10.0
libtpu: 0.0.40
codegen_flags: <defaults>
</compile_context>

<pallas_src>
import jax
import jax.numpy as jnp
from jax.experimental import pallas as pl
from jax.experimental.pallas import tpu as pltpu

# Logical (torch) layer sizes and their TPU-padded counterparts.
H1, H2, OUT = 400, 100, 3
H1_P, H2_P, OUT_P = 512, 128, 128


def _round_up(n, m):
    return (n + m - 1) // m * m


def mlp_kernel(x_ref, w1_ref, b1_ref, w2_ref, b2_ref, w3_ref, b3_ref, o_ref):
    # Layer 1: Linear + ReLU (MXU matmul, f32 accumulation).
    h1 = jnp.dot(x_ref[...], w1_ref[...], preferred_element_type=jnp.float32)
    h1 = jnp.maximum(h1 + b1_ref[...], 0.0)
    # Layer 2: Linear + ReLU.
    h2 = jnp.dot(h1, w2_ref[...], preferred_element_type=jnp.float32)
    h2 = jnp.maximum(h2 + b2_ref[...], 0.0)
    # Layer 3: Linear -> lane-dense (TM, 128) store; cols 3..127 are exactly zero.
    o_ref[...] = (jnp.dot(h2, w3_ref[...], preferred_element_type=jnp.float32)
                  + b3_ref[...]).astype(o_ref.dtype)


def mlp_forward(x, padded_params, *, tm_max=256):
    """x: [B, input_size] float32. padded_params: output of pad_params(). Returns [B, 3]."""
    B, D = x.shape
    d_in_p = padded_params["w1"].shape[0]
    assert D <= d_in_p

    # Adaptive batch tile: minimize padded rows while keeping >=2 tiles for large
    # batches (megacore) and the sublane-multiple-of-8 constraint.
    n_tiles = max(1, -(-B // tm_max))                 # ceil(B / tm_max)
    tm = _round_up(-(-B // n_tiles), 8)               # per-tile rows, multiple of 8
    b_pad = n_tiles * tm

    # Pad batch up to n_tiles*tm and features up to d_in_p (zero-padding is exact).
    x_pad = jnp.zeros((b_pad, d_in_p), x.dtype).at[:B, :D].set(x)

    def resident(shape):
        # Full-array block, constant block index -> DMA'd once, stays in VMEM.
        return pl.BlockSpec(shape, lambda i: (0, 0))

    out_padded = pl.pallas_call(
        mlp_kernel,
        out_shape=jax.ShapeDtypeStruct((b_pad, OUT_P), jnp.float32),
        grid=(n_tiles,),
        in_specs=[
            pl.BlockSpec((tm, d_in_p), lambda i: (i, 0)),   # x: tiled over batch
            resident((d_in_p, H1_P)),                       # w1
            resident((1, H1_P)),                            # b1
            resident((H1_P, H2_P)),                         # w2
            resident((1, H2_P)),                            # b2
            resident((H2_P, OUT_P)),                        # w3
            resident((1, OUT_P)),                           # b3
        ],
        out_specs=pl.BlockSpec((tm, OUT_P), lambda i: (i, 0)),
        compiler_params=pltpu.CompilerParams(
            dimension_semantics=("parallel",)),
    )(x_pad, padded_params["w1"], padded_params["b1"],
      padded_params["w2"], padded_params["b2"],
      padded_params["w3"], padded_params["b3"])

    return out_padded[:B, :OUT]


def init_params(key, input_size):
    """Logical (unpadded) params mimicking torch.nn.Linear default init.

    Weights are stored as [in_features, out_features] (transposed vs. torch);
    biases are [1, out_features].
    """
    dims = [(input_size, H1), (H1, H2), (H2, OUT)]
    params = {}
    for idx, (fan_in, fan_out) in enumerate(dims, start=1):
        key, kw, kb = jax.random.split(key, 3)
        bound = 1.0 / jnp.sqrt(jnp.float32(fan_in))
        params[f"w{idx}"] = jax.random.uniform(
            kw, (fan_in, fan_out), jnp.float32, -bound, bound)
        params[f"b{idx}"] = jax.random.uniform(
            kb, (1, fan_out), jnp.float32, -bound, bound)
    return params


def pad_params(params, input_size):
    """Zero-pad params once to MXU/vreg-friendly shapes (done outside the kernel)."""
    d_in_p = _round_up(input_size, 128)

    def pad2(a, rows, cols):
        return jnp.zeros((rows, cols), a.dtype).at[:a.shape[0], :a.shape[1]].set(a)

    return {
        "w1": pad2(params["w1"], d_in_p, H1_P),
        "b1": pad2(params["b1"], 1, H1_P),
        "w2": pad2(params["w2"], H1_P, H2_P),
        "b2": pad2(params["b2"], 1, H2_P),
        "w3": pad2(params["w3"], H2_P, OUT_P),
        "b3": pad2(params["b3"], 1, OUT_P),
    }


def mlp_reference(x, params):
    h1 = jnp.maximum(x @ params["w1"] + params["b1"], 0.0)
    h2 = jnp.maximum(h1 @ params["w2"] + params["b2"], 0.0)
    return h2 @ params["w3"] + params["b3"]


if __name__ == "__main__":
    key = jax.random.PRNGKey(0)
    input_size = 64
    kx_small, kx_big, kp = jax.random.split(key, 3)

    params = init_params(kp, input_size)
    padded = pad_params(params, input_size)

    # Small batch: single grid step, tile shrunk to 8 rows (no wasted compute).
    x_small = jax.random.normal(kx_small, (8, input_size), jnp.float32)
    out_small = jax.block_until_ready(mlp_forward(x_small, padded))
    ref_small = mlp_reference(x_small, params)
    assert out_small.shape == (8, OUT), out_small.shape
    assert jnp.allclose(out_small, ref_small, atol=1e-4, rtol=1e-4), "small-batch mismatch"

    # Non-tile-divisible batch: exercises multiple grid steps + batch padding/slicing.
    x_big = jax.random.normal(kx_big, (300, input_size), jnp.float32)
    out_big = jax.block_until_ready(mlp_forward(x_big, padded))
    ref_big = mlp_reference(x_big, params)
    assert out_big.shape == (300, OUT), out_big.shape
    assert jnp.allclose(out_big, ref_big, atol=1e-4, rtol=1e-4), "big-batch mismatch"

    print("KERNEL_OK")
</pallas_src>

<mosaic_0001>
module attributes {stable_mosaic.version = 11 : i64} {
  func.func @mlp_kernel(%arg0: i32, %arg1: memref<8x128xf32, #tpu.memory_space<vmem>>, %arg2: memref<128x512xf32, #tpu.memory_space<vmem>>, %arg3: memref<1x512xf32, #tpu.memory_space<vmem>>, %arg4: memref<512x128xf32, #tpu.memory_space<vmem>>, %arg5: memref<1x128xf32, #tpu.memory_space<vmem>>, %arg6: memref<128x128xf32, #tpu.memory_space<vmem>>, %arg7: memref<1x128xf32, #tpu.memory_space<vmem>>, %arg8: memref<8x128xf32, #tpu.memory_space<vmem>>) attributes {dimension_semantics = [#tpu.dimension_semantics<parallel>], iteration_bounds = array<i64: 1>, scalar_prefetch = 0 : i64, scratch_operands = 0 : i64, tpu.core_type = #tpu.core_type<tc>, window_params = [{transform_indices = @transform_0, window_bounds = array<i64: 8, 128>}, {pipeline_mode = #tpu.pipeline_mode<synchronous>, transform_indices = @transform_1, window_bounds = array<i64: 128, 512>}, {pipeline_mode = #tpu.pipeline_mode<synchronous>, transform_indices = @transform_2, window_bounds = array<i64: 1, 512>}, {pipeline_mode = #tpu.pipeline_mode<synchronous>, transform_indices = @transform_3, window_bounds = array<i64: 512, 128>}, {pipeline_mode = #tpu.pipeline_mode<synchronous>, transform_indices = @transform_4, window_bounds = array<i64: 1, 128>}, {pipeline_mode = #tpu.pipeline_mode<synchronous>, transform_indices = @transform_5, window_bounds = array<i64: 128, 128>}, {pipeline_mode = #tpu.pipeline_mode<synchronous>, transform_indices = @transform_6, window_bounds = array<i64: 1, 128>}, {transform_indices = @transform_7, window_bounds = array<i64: 8, 128>}]} {
    %c0 = arith.constant 0 : index
    %c0_0 = arith.constant 0 : index
    %0 = vector.load %arg1[%c0, %c0_0] : memref<8x128xf32, #tpu.memory_space<vmem>>, vector<8x128xf32>
    %c0_1 = arith.constant 0 : index
    %c0_2 = arith.constant 0 : index
    %1 = vector.load %arg2[%c0_1, %c0_2] : memref<128x512xf32, #tpu.memory_space<vmem>>, vector<128x512xf32>
    %cst = arith.constant dense<0.000000e+00> : vector<8x512xf32>
    %2 = tpu.matmul %0, %1, %cst {dimension_numbers = #tpu.dot_dimension_numbers<[1], [0], [0], [1], [0, 0, 1, 1], [], []>} : vector<8x128xf32>, vector<128x512xf32>, vector<8x512xf32> -> vector<8x512xf32>
    %c0_3 = arith.constant 0 : index
    %c0_4 = arith.constant 0 : index
    %3 = vector.load %arg3[%c0_3, %c0_4] : memref<1x512xf32, #tpu.memory_space<vmem>>, vector<1x512xf32>
    %4 = vector.broadcast %3 : vector<1x512xf32> to vector<8x512xf32>
    %5 = arith.addf %2, %4 : vector<8x512xf32>
    %cst_5 = arith.constant 0.000000e+00 : f32
    %6 = vector.broadcast %cst_5 : f32 to vector<8x512xf32>
    %7 = arith.maximumf %5, %6 : vector<8x512xf32>
    %c0_6 = arith.constant 0 : index
    %c0_7 = arith.constant 0 : index
    %8 = vector.load %arg4[%c0_6, %c0_7] : memref<512x128xf32, #tpu.memory_space<vmem>>, vector<512x128xf32>
    %cst_8 = arith.constant dense<0.000000e+00> : vector<8x128xf32>
    %9 = tpu.matmul %7, %8, %cst_8 {dimension_numbers = #tpu.dot_dimension_numbers<[1], [0], [0], [1], [0, 0, 1, 1], [], []>} : vector<8x512xf32>, vector<512x128xf32>, vector<8x128xf32> -> vector<8x128xf32>
    %c0_9 = arith.constant 0 : index
    %c0_10 = arith.constant 0 : index
    %10 = vector.load %arg5[%c0_9, %c0_10] : memref<1x128xf32, #tpu.memory_space<vmem>>, vector<1x128xf32>
    %11 = vector.broadcast %10 : vector<1x128xf32> to vector<8x128xf32>
    %12 = arith.addf %9, %11 : vector<8x128xf32>
    %cst_11 = arith.constant 0.000000e+00 : f32
    %13 = vector.broadcast %cst_11 : f32 to vector<8x128xf32>
    %14 = arith.maximumf %12, %13 : vector<8x128xf32>
    %c0_12 = arith.constant 0 : index
    %c0_13 = arith.constant 0 : index
    %15 = vector.load %arg6[%c0_12, %c0_13] : memref<128x128xf32, #tpu.memory_space<vmem>>, vector<128x128xf32>
    %cst_14 = arith.constant dense<0.000000e+00> : vector<8x128xf32>
    %16 = tpu.matmul %14, %15, %cst_14 {dimension_numbers = #tpu.dot_dimension_numbers<[1], [0], [0], [1], [0, 0, 1, 1], [], []>} : vector<8x128xf32>, vector<128x128xf32>, vector<8x128xf32> -> vector<8x128xf32>
    %c0_15 = arith.constant 0 : index
    %c0_16 = arith.constant 0 : index
    %17 = vector.load %arg7[%c0_15, %c0_16] : memref<1x128xf32, #tpu.memory_space<vmem>>, vector<1x128xf32>
    %18 = vector.broadcast %17 : vector<1x128xf32> to vector<8x128xf32>
    %19 = arith.addf %16, %18 : vector<8x128xf32>
    %c0_17 = arith.constant 0 : index
    %c0_18 = arith.constant 0 : index
    %20 = vector.load %arg8[%c0_17, %c0_18] : memref<8x128xf32, #tpu.memory_space<vmem>>, vector<8x128xf32>
    tpu.vector_store %arg8[%c0_17, %c0_18], %19 {strides = array<i32>} : memref<8x128xf32, #tpu.memory_space<vmem>>, vector<8x128xf32>,
    return
  }
  func.func @transform_0(%arg0: i32) -> (i32, i32) {
    %c0_i32 = arith.constant 0 : i32
    %c0_i32_0 = arith.constant 0 : i32
    return %arg0, %c0_i32 : i32, i32
  }
  func.func @transform_1(%arg0: i32) -> (i32, i32) {
    %c0_i32 = arith.constant 0 : i32
    %c0_i32_0 = arith.constant 0 : i32
    %c0_i32_1 = arith.constant 0 : i32
    return %c0_i32, %c0_i32_0 : i32, i32
  }
  func.func @transform_2(%arg0: i32) -> (i32, i32) {
    %c0_i32 = arith.constant 0 : i32
    %c0_i32_0 = arith.constant 0 : i32
    %c0_i32_1 = arith.constant 0 : i32
    return %c0_i32, %c0_i32_0 : i32, i32
  }
  func.func @transform_3(%arg0: i32) -> (i32, i32) {
    %c0_i32 = arith.constant 0 : i32
    %c0_i32_0 = arith.constant 0 : i32
    %c0_i32_1 = arith.constant 0 : i32
    return %c0_i32, %c0_i32_0 : i32, i32
  }
  func.func @transform_4(%arg0: i32) -> (i32, i32) {
    %c0_i32 = arith.constant 0 : i32
    %c0_i32_0 = arith.constant 0 : i32
    %c0_i32_1 = arith.constant 0 : i32
    return %c0_i32, %c0_i32_0 : i32, i32
  }
  func.func @transform_5(%arg0: i32) -> (i32, i32) {
    %c0_i32 = arith.constant 0 : i32
    %c0_i32_0 = arith.constant 0 : i32
    %c0_i32_1 = arith.constant 0 : i32
    return %c0_i32, %c0_i32_0 : i32, i32
  }
  func.func @transform_6(%arg0: i32) -> (i32, i32) {
    %c0_i32 = arith.constant 0 : i32
    %c0_i32_0 = arith.constant 0 : i32
    %c0_i32_1 = arith.constant 0 : i32
    return %c0_i32, %c0_i32_0 : i32, i32
  }
  func.func @transform_7(%arg0: i32) -> (i32, i32) {
    %c0_i32 = arith.constant 0 : i32
    %c0_i32_0 = arith.constant 0 : i32
    return %arg0, %c0_i32 : i32, i32
  }
}

</mosaic_0001>

<bundles_post_ra>
// kernel: tpu_custom_call.1
= control target key start
LH: loop header
LB: loop body
LE: loop exit
PB: predicated region body
PF: predicated region fallthrough
CT: control target
= control target key end

     0   :  { %12 = vsyncpa [#allocation3], 0  ;;  %s1166_s0 = inlined_call_operand.hbm [shape: f32[8,128], index: 0, kind: input, shape index: {}]   ;;  %s1167_s1 = inlined_call_operand.hbm [shape: f32[128,512], index: 1, kind: input, shape index: {}]   ;;  %s1168_s2 = inlined_call_operand.vmem [shape: f32[1,512], index: 2, kind: input, shape index: {}]   ;;  %s1169_s3 = inlined_call_operand.hbm [shape: f32[512,128], index: 3, kind: input, shape index: {}]   ;;  %s1170_s4 = inlined_call_operand.vmem [shape: f32[1,128], index: 4, kind: input, shape index: {}]   ;;  %s1171_s5 = inlined_call_operand.hbm [shape: f32[128,128], index: 5, kind: input, shape index: {}]   ;;  %s1172_s6 = inlined_call_operand.vmem [shape: f32[1,128], index: 6, kind: input, shape index: {}]   ;;  %s1173_s7 = inlined_call_operand.hbm [shape: f32[8,128], index: 7, kind: output, shape index: {}]  }
   0x1   :  { %13 = vsyncpa [#allocation6], 0 }
   0x2   :  { %14 = vsyncpa [#allocation9], 0 }
   0x3   :  { %15 = vsyncpa [#allocation4], 0  ;;  %s1042_s24 = smov [#allocation5]   ;;  %s924_s28 = scalar_lea.hbm %s1167_s1, 8192 }
   0x4   :  { %s31_s25 = sshll.u32 %s1042_s24, 4  ;;  %p925_p0 = scmp.ne.s32.totalorder %s1167_s1, %s924_s28  ;;  %s32_s25 = int_to_ptr.vmem [resolvable:$true] %s31_s25 }
   0x5   :  { %p928_p1 = scmp.lt.u32.totalorder %s924_s28, %s1167_s1 }
   0x7   :  { %p930_p2 = pnand %p928_p1, %p925_p0 }
   0x9   :  { %933 = shalt.err (!%p930_p2)
}
   0xa   :  { %s934_s10 = scalar_lea.vmem %s32_s25, 8192  ;;  %p939_p4 = scmp.lt.s32.totalorder %s32_s25, %s32_s25 }
   0xb   :  { %p935_p3 = scmp.ne.s32.totalorder %s32_s25, %s934_s10  ;;  %p940_p5 = scmp.lt.s32.totalorder %s934_s10, %s934_s10 }
   0xd   :  { %p941_p6 = por %p940_p5, %p939_p4 }
   0xf   :  { %p942_p7 = pnand %p941_p6, %p935_p3 }
  0x11   :  { %945 = shalt.err (!%p942_p7)
}
  0x12   :  { %s1043_s11 = smov 512   ;;  %s1044_s12 = smov 32  }
  0x13   :  { %37 = dma.hbm_to_vmem [thread:$0]  %s1167_s1, 8192, %s32_s25, [#allocation6], %s1043_s11, %s1043_s11, %s1044_s12  }
  0x14   :  { %s1045_s15 = smov [#allocation2]   ;;  %s1046_s17 = smov [#allocation7]  }
  0x15   :  { %s22_s16 = sshll.u32 %s1045_s15, 4  ;;  %s45_s18 = sshll.u32 %s1046_s17, 4  ;;  %s23_s16 = int_to_ptr.vmem [resolvable:$true] %s22_s16  ;;  %s46_s18 = int_to_ptr.vmem [resolvable:$true] %s45_s18 }
  0x16   :  { %s946_s21 = scalar_lea.hbm %s1166_s0, 128 }
  0x17   :  { %p947_p8 = scmp.ne.s32.totalorder %s1166_s0, %s946_s21  ;;  %p950_p9 = scmp.lt.u32.totalorder %s946_s21, %s1166_s0 }
  0x19   :  { %p952_p10 = pnand %p950_p9, %p947_p8 }
  0x1b   :  { %955 = shalt.err (!%p952_p10)
}
  0x1c   :  { %s956_s1 = scalar_lea.vmem %s23_s16, 128  ;;  %p961_p12 = scmp.lt.s32.totalorder %s23_s16, %s23_s16 }
  0x1d   :  { %p957_p11 = scmp.ne.s32.totalorder %s23_s16, %s956_s1  ;;  %p962_p13 = scmp.lt.s32.totalorder %s956_s1, %s956_s1 }
  0x1f   :  { %p963_p0 = por %p962_p13, %p961_p12 }
  0x21   :  { %p964_p1 = pnand %p963_p0, %p957_p11 }
  0x23   :  { %967 = shalt.err (!%p964_p1)
}
  0x24   :  { %25 = dma.hbm_to_vmem [thread:$0]  %s1166_s0, 128, %s23_s16, [#allocation3]  }
  0x25   :  { %s968_s30 = scalar_lea.hbm %s1169_s3, 8192 }
  0x26   :  { %p969_p2 = scmp.ne.s32.totalorder %s1169_s3, %s968_s30  ;;  %p972_p3 = scmp.lt.u32.totalorder %s968_s30, %s1169_s3 }
  0x28   :  { %p974_p4 = pnand %p972_p3, %p969_p2 }
  0x2a   :  { %977 = shalt.err (!%p974_p4)
}
  0x2b   :  { %s978_s12 = scalar_lea.vmem %s46_s18, 8192  ;;  %p983_p6 = scmp.lt.s32.totalorder %s46_s18, %s46_s18 }
  0x2c   :  { %p979_p5 = scmp.ne.s32.totalorder %s46_s18, %s978_s12  ;;  %p984_p7 = scmp.lt.s32.totalorder %s978_s12, %s978_s12 }
  0x2e   :  { %p985_p8 = por %p984_p7, %p983_p6 }
  0x30   :  { %p986_p9 = pnand %p985_p8, %p979_p5 }
  0x32   :  { %989 = shalt.err (!%p986_p9)
}
  0x33   :  { %s1047_s0 = smov 128   ;;  %s1048_s13 = smov 8  }
  0x34   :  { %51 = dma.hbm_to_vmem [thread:$0]  %s1169_s3, 8192, %s46_s18, [#allocation6], %s1047_s0, %s1047_s0, %s1048_s13  }
  0x35   :  { %s1049_s16 = smov [#allocation8]   ;;  %s990_s21 = scalar_lea.hbm %s1171_s5, 2048 }
  0x36   :  { %s59_s17 = sshll.u32 %s1049_s16, 4  ;;  %p991_p10 = scmp.ne.s32.totalorder %s1171_s5, %s990_s21  ;;  %s60_s17 = int_to_ptr.vmem [resolvable:$true] %s59_s17 }
  0x37   :  { %p994_p11 = scmp.lt.u32.totalorder %s990_s21, %s1171_s5 }
  0x39   :  { %p996_p12 = pnand %p994_p11, %p991_p10 }
  0x3b   :  { %999 = shalt.err (!%p996_p12)
}
  0x3c   :  { %s1000_s1 = scalar_lea.vmem %s60_s17, 2048  ;;  %p1005_p0 = scmp.lt.s32.totalorder %s60_s17, %s60_s17 }
  0x3d   :  { %p1001_p13 = scmp.ne.s32.totalorder %s60_s17, %s1000_s1  ;;  %p1006_p1 = scmp.lt.s32.totalorder %s1000_s1, %s1000_s1 }
  0x3f   :  { %p1007_p2 = por %p1006_p1, %p1005_p0 }
  0x41   :  { %p1008_p3 = pnand %p1007_p2, %p1001_p13 }
  0x43   :  { %1011 = shalt.err (!%p1008_p3)
}
  0x44   :  { %65 = dma.hbm_to_vmem [thread:$0]  %s1171_s5, 2048, %s60_s17, [#allocation9], %s1047_s0, %s1047_s0, %s1048_s13  }
  0x45   :  { %1034 = dma.done.wait [#allocation3], 128  }
  0x46   :  { %1035 = vsyncadd [#allocation3], 4294967168 }
  0x47   :  { %1036 = dma.done.wait [#allocation6], 16384  }
  0x48   :  { %1037 = vsyncadd [#allocation6], 4294950912 }
  0x49   :  { %1038 = dma.done.wait [#allocation9], 2048  }
  0x4a   :  { %1039 = vsyncadd [#allocation9], 4294965248  ;;  %v1050_v0 = vmov 0.0   ;;  %v82_v1 = vld [vmem:[#allocation5 + $0x8] sm:$0xff]  ;;  %v84_v3 = vld [vmem:[#allocation5 + $0x18] sm:$0xff]  ;;  %vm1052_vm0 = vmmov 0  }
  0x4b   :  { %231 = vmatprep.mubr.f32.mxu0 %v1050_v0  ;;  %302 = vmatprep.mubr.f32.mxu1 %v1050_v0  ;;  %v86_v2 = vld [vmem:[#allocation5 + $0x28] sm:$0xff]  ;;  %v88_v5 = vld [vmem:[#allocation5 + $0x38] sm:$0xff]  ;;  %v81_v6 = vld [vmem:[#allocation5] sm:$0xff]  ;;  %s1053_s30 = smov [#allocation10]  }
  0x4c   :  { %v760_v4 = vpack.c.bf16 %v86_v2, %v82_v1  ;;  %v85_v7 = vld [vmem:[#allocation5 + $0x20] sm:$0xff]  ;;  %v792_v8 = vpack.c.bf16 %v88_v5, %v84_v3  ;;  %v83_v10 = vld [vmem:[#allocation5 + $0x10] sm:$0xff]  ;;  %v90_v12 = vld [vmem:[#allocation5 + $0x48] sm:$0xff]  ;;  %s625_s8 = sshll.u32 %s1053_s30, 4  ;;  %s626_s8 = int_to_ptr.vmem [resolvable:$true] %s625_s8 }
  0x4d   :  { %v762_v9 = vpack.c.bf16 %v85_v7, %v81_v6  ;;  %v87_v11 = vld [vmem:[#allocation5 + $0x30] sm:$0xff]  ;;  %v94_v14 = vld [vmem:[#allocation5 + $0x68] sm:$0xff]  ;;  %v92_v15 = vld [vmem:[#allocation5 + $0x58] sm:$0xff]  ;;  %p1017_p5 = scmp.lt.s32.totalorder %s626_s8, %s626_s8 }
  0x4e   :  { %761 = vmatprep.subr.bf16.mxu0 %v760_v4  ;;  %v794_v13 = vpack.c.bf16 %v87_v11, %v83_v10  ;;  %v96_v16 = vld [vmem:[#allocation5 + $0x78] sm:$0xff]  ;;  %793 = vmatprep.subr.bf16.mxu1 %v792_v8  ;;  %v764_v17 = vpack.c.bf16 %v94_v14, %v90_v12  ;;  %v89_v19 = vld [vmem:[#allocation5 + $0x40] sm:$0xff]  ;;  %v91_v21 = vld [vmem:[#allocation5 + $0x50] sm:$0xff] }
  0x4f   :  { %763 = vmatpush1.bf16.msra.mxu0 %v762_v9  ;;  %v796_v18 = vpack.c.bf16 %v96_v16, %v92_v15  ;;  %v93_v20 = vld [vmem:[#allocation5 + $0x60] sm:$0xff]  ;;  %v95_v23 = vld [vmem:[#allocation5 + $0x70] sm:$0xff]  ;;  %v98_v24 = vld [vmem:[#allocation5 + $0x88] sm:$0xff] }
  0x50   :  { %795 = vmatpush1.bf16.msra.mxu1 %v794_v13  ;;  %v766_v22 = vpack.c.bf16 %v93_v20, %v89_v19  ;;  %v102_v25 = vld [vmem:[#allocation5 + $0xa8] sm:$0xff]  ;;  %765 = vmatprep.subr.bf16.mxu0 %v764_v17  ;;  %v798_v26 = vpack.c.bf16 %v95_v23, %v91_v21  ;;  %v100_v28 = vld [vmem:[#allocation5 + $0x98] sm:$0xff]  ;;  %v97_v30 = vld [vmem:[#allocation5 + $0x80] sm:$0xff] }
  0x51   :  { %797 = vmatprep.subr.bf16.mxu1 %v796_v18  ;;  %v768_v27 = vpack.c.bf16 %v102_v25, %v98_v24  ;;  %v104_v29 = vld [vmem:[#allocation5 + $0xb8] sm:$0xff]  ;;  %v101_v32 = vld [vmem:[#allocation5 + $0xa0] sm:$0xff]  ;;  %v99_v33 = vld [vmem:[#allocation5 + $0x90] sm:$0xff] }
  0x52   :  { %v800_v31 = vpack.c.bf16 %v104_v29, %v100_v28  ;;  %v103_v34 = vld [vmem:[#allocation5 + $0xb0] sm:$0xff]  ;;  %v770_v35 = vpack.c.bf16 %v101_v32, %v97_v30  ;;  %v106_v36 = vld [vmem:[#allocation5 + $0xc8] sm:$0xff]  ;;  %v108_v38 = vld [vmem:[#allocation5 + $0xd8] sm:$0xff] }
  0x53   :  { %767 = vmatpush1.bf16.msra.mxu0 %v766_v22  ;;  %v110_v37 = vld [vmem:[#allocation5 + $0xe8] sm:$0xff]  ;;  %v802_v39 = vpack.c.bf16 %v103_v34, %v99_v33  ;;  %v112_v41 = vld [vmem:[#allocation5 + $0xf8] sm:$0xff]  ;;  %v105_v42 = vld [vmem:[#allocation5 + $0xc0] sm:$0xff] }
  0x54   :  { %799 = vmatpush1.bf16.msra.mxu1 %v798_v26  ;;  %769 = vmatprep.subr.bf16.mxu0 %v768_v27  ;;  %v772_v40 = vpack.c.bf16 %v110_v37, %v106_v36  ;;  %v109_v43 = vld [vmem:[#allocation5 + $0xe0] sm:$0xff]  ;;  %v804_v44 = vpack.c.bf16 %v112_v41, %v108_v38  ;;  %v107_v45 = vld [vmem:[#allocation5 + $0xd0] sm:$0xff]  ;;  %v114_v47 = vld [vmem:[#allocation5 + $0x108] sm:$0xff] }
  0x55   :  { %801 = vmatprep.subr.bf16.mxu1 %v800_v31  ;;  %v111_v46 = vld [vmem:[#allocation5 + $0xf0] sm:$0xff]  ;;  %v118_v48 = vld [vmem:[#allocation5 + $0x128] sm:$0xff]  ;;  %v116_v49 = vld [vmem:[#allocation5 + $0x118] sm:$0xff]  ;;  %v774_v51 = vpack.c.bf16 %v109_v43, %v105_v42 }
  0x56   :  { %v120_v50 = vld [vmem:[#allocation5 + $0x138] sm:$0xff]  ;;  %v806_v52 = vpack.c.bf16 %v111_v46, %v107_v45  ;;  %v776_v53 = vpack.c.bf16 %v118_v48, %v114_v47  ;;  %v113_v54 = vld [vmem:[#allocation5 + $0x100] sm:$0xff]  ;;  %v115_v56 = vld [vmem:[#allocation5 + $0x110] sm:$0xff] }
  0x57   :  { %771 = vmatpush1.bf16.msra.mxu0 %v770_v35  ;;  %v117_v55 = vld [vmem:[#allocation5 + $0x120] sm:$0xff]  ;;  %v808_v57 = vpack.c.bf16 %v120_v50, %v116_v49  ;;  %v119_v58 = vld [vmem:[#allocation5 + $0x130] sm:$0xff]  ;;  %v122_v59 = vld [vmem:[#allocation5 + $0x148] sm:$0xff] }
  0x58   :  { %803 = vmatpush1.bf16.msra.mxu1 %v802_v39  ;;  %773 = vmatprep.subr.bf16.mxu0 %v772_v40  ;;  %v126_v60 = vld [vmem:[#allocation5 + $0x168] sm:$0xff]  ;;  %v124_v61 = vld [vmem:[#allocation5 + $0x158] sm:$0xff]  ;;  %v778_v63 = vpack.c.bf16 %v117_v55, %v113_v54  ;;  %v810_v1 = vpack.c.bf16 %v119_v58, %v115_v56  ;;  %v121_v3 = vld [vmem:[#allocation5 + $0x140] sm:$0xff] }
  0x59   :  { %805 = vmatprep.subr.bf16.mxu1 %v804_v44  ;;  %v128_v62 = vld [vmem:[#allocation5 + $0x178] sm:$0xff]  ;;  %v780_v2 = vpack.c.bf16 %v126_v60, %v122_v59  ;;  %v125_v4 = vld [vmem:[#allocation5 + $0x160] sm:$0xff]  ;;  %v123_v5 = vld [vmem:[#allocation5 + $0x150] sm:$0xff] }
  0x5a   :  { %v812_v6 = vpack.c.bf16 %v128_v62, %v124_v61  ;;  %v127_v7 = vld [vmem:[#allocation5 + $0x170] sm:$0xff]  ;;  %v130_v8 = vld [vmem:[#allocation5 + $0x188] sm:$0xff]  ;;  %v132_v10 = vld [vmem:[#allocation5 + $0x198] sm:$0xff]  ;;  %v782_v12 = vpack.c.bf16 %v125_v4, %v121_v3 }
  0x5b   :  { %775 = vmatpush1.bf16.msra.mxu0 %v774_v51  ;;  %v134_v9 = vld [vmem:[#allocation5 + $0x1a8] sm:$0xff]  ;;  %v136_v11 = vld [vmem:[#allocation5 + $0x1b8] sm:$0xff]  ;;  %v814_v13 = vpack.c.bf16 %v127_v7, %v123_v5  ;;  %v129_v15 = vld [vmem:[#allocation5 + $0x180] sm:$0xff] }
  0x5c   :  { %807 = vmatpush1.bf16.msra.mxu1 %v806_v52  ;;  %777 = vmatprep.subr.bf16.mxu0 %v776_v53  ;;  %v784_v14 = vpack.c.bf16 %v134_v9, %v130_v8  ;;  %v133_v16 = vld [vmem:[#allocation5 + $0x1a0] sm:$0xff]  ;;  %v131_v17 = vld [vmem:[#allocation5 + $0x190] sm:$0xff]  ;;  %v816_v18 = vpack.c.bf16 %v136_v11, %v132_v10  ;;  %v138_v20 = vld [vmem:[#allocation5 + $0x1c8] sm:$0xff] }
  0x5d   :  { %809 = vmatprep.subr.bf16.mxu1 %v808_v57  ;;  %v135_v19 = vld [vmem:[#allocation5 + $0x1b0] sm:$0xff]  ;;  %v142_v21 = vld [vmem:[#allocation5 + $0x1e8] sm:$0xff]  ;;  %v140_v22 = vld [vmem:[#allocation5 + $0x1d8] sm:$0xff]  ;;  %v786_v24 = vpack.c.bf16 %v133_v16, %v129_v15 }
  0x5e   :  { %v144_v23 = vld [vmem:[#allocation5 + $0x1f8] sm:$0xff]  ;;  %v818_v25 = vpack.c.bf16 %v135_v19, %v131_v17  ;;  %v788_v26 = vpack.c.bf16 %v142_v21, %v138_v20  ;;  %v137_v27 = vld [vmem:[#allocation5 + $0x1c0] sm:$0xff]  ;;  %v139_v29 = vld [vmem:[#allocation5 + $0x1d0] sm:$0xff] }
  0x5f   :  { %779 = vmatpush1.bf16.msra.mxu0 %v778_v63  ;;  %v141_v28 = vld [vmem:[#allocation5 + $0x1e0] sm:$0xff]  ;;  %v820_v30 = vpack.c.bf16 %v144_v23, %v140_v22  ;;  %v143_v31 = vld [vmem:[#allocation5 + $0x1f0] sm:$0xff]  ;;  %v330_v33 = vld [vmem:[#allocation7 + $0x88] sm:$0xff] }
  0x60   :  { %811 = vmatpush1.bf16.msra.mxu1 %v810_v1  ;;  %781 = vmatprep.subr.bf16.mxu0 %v780_v2  ;;  %v329_v32 = vld [vmem:[#allocation7 + $0x80] sm:$0xff]  ;;  %v362_v35 = vld [vmem:[#allocation7 + $0x188] sm:$0xff]  ;;  %v790_v36 = vpack.c.bf16 %v141_v28, %v137_v27  ;;  %v822_v37 = vpack.c.bf16 %v143_v31, %v139_v29  ;;  %v331_v44 = vld [vmem:[#allocation7 + $0x90] sm:$0xff] }
  0x61   :  { %813 = vmatprep.subr.bf16.mxu1 %v812_v6  ;;  %v361_v34 = vld [vmem:[#allocation7 + $0x180] sm:$0xff]  ;;  %v824_v38 = vpack.c.bf16 %v330_v33, %v329_v32  ;;  %v314_v40 = vld [vmem:[#allocation7 + $0x8] sm:$0xff]  ;;  %v332_v45 = vld [vmem:[#allocation7 + $0x98] sm:$0xff] }
  0x62   :  { %v313_v39 = vld [vmem:[#allocation7] sm:$0xff]  ;;  %v856_v42 = vpack.c.bf16 %v362_v35, %v361_v34  ;;  %v346_v43 = vld [vmem:[#allocation7 + $0x108] sm:$0xff]  ;;  %v363_v46 = vld [vmem:[#allocation7 + $0x190] sm:$0xff]  ;;  %v828_v51 = vpack.c.bf16 %v332_v45, %v331_v44 }
  0x63   :  { %783 = vmatpush1.bf16.msra.mxu0 %v782_v12  ;;  %v345_v41 = vld [vmem:[#allocation7 + $0x100] sm:$0xff]  ;;  %v364_v47 = vld [vmem:[#allocation7 + $0x198] sm:$0xff]  ;;  %v826_v49 = vpack.c.bf16 %v314_v40, %v313_v39  ;;  %v315_v52 = vld [vmem:[#allocation7 + $0x10] sm:$0xff] }
  0x64   :  { %815 = vmatpush1.bf16.msra.mxu1 %v814_v13  ;;  %785 = vmatprep.subr.bf16.mxu0 %v784_v14  ;;  %v80_v48 = vld [vmem:[#allocation2] sm:$0xff]  ;;  %v858_v50 = vpack.c.bf16 %v346_v43, %v345_v41  ;;  %v347_v54 = vld [vmem:[#allocation7 + $0x110] sm:$0xff]  ;;  %v860_v55 = vpack.c.bf16 %v364_v47, %v363_v46  ;;  %v333_v57 = vld [vmem:[#allocation7 + $0xa0] sm:$0xff] }
  0x65   :  { %817 = vmatprep.subr.bf16.mxu1 %v816_v18  ;;  %v316_v53 = vld [vmem:[#allocation7 + $0x18] sm:$0xff]  ;;  %v334_v58 = vld [vmem:[#allocation7 + $0xa8] sm:$0xff]  ;;  %v365_v59 = vld [vmem:[#allocation7 + $0x1a0] sm:$0xff] }
  0x66   :  { %v348_v56 = vld [vmem:[#allocation7 + $0x118] sm:$0xff]  ;;  %v366_v60 = vld [vmem:[#allocation7 + $0x1a8] sm:$0xff]  ;;  %v830_v61 = vpack.c.bf16 %v316_v53, %v315_v52  ;;  %v832_v63 = vpack.c.bf16 %v334_v58, %v333_v57  ;;  %v317_v1 = vld [vmem:[#allocation7 + $0x20] sm:$0xff] }
  0x67   :  { %787 = vmatpush1.bf16.msra.mxu0 %v786_v24  ;;  %v862_v62 = vpack.c.bf16 %v348_v56, %v347_v54  ;;  %v318_v2 = vld [vmem:[#allocation7 + $0x28] sm:$0xff]  ;;  %v349_v3 = vld [vmem:[#allocation7 + $0x120] sm:$0xff]  ;;  %v864_v4 = vpack.c.bf16 %v366_v60, %v365_v59  ;;  %v335_v6 = vld [vmem:[#allocation7 + $0xb0] sm:$0xff] }
  0x68   :  { %819 = vmatpush1.bf16.msra.mxu1 %v818_v25  ;;  %789 = vmatprep.subr.bf16.mxu0 %v788_v26  ;;  %v350_v5 = vld [vmem:[#allocation7 + $0x128] sm:$0xff]  ;;  %v336_v7 = vld [vmem:[#allocation7 + $0xb8] sm:$0xff]  ;;  %v367_v8 = vld [vmem:[#allocation7 + $0x1b0] sm:$0xff]  ;;  %v834_v10 = vpack.c.bf16 %v318_v2, %v317_v1 }
  0x69   :  { %821 = vmatprep.subr.bf16.mxu1 %v820_v30  ;;  %v368_v9 = vld [vmem:[#allocation7 + $0x1b8] sm:$0xff]  ;;  %v866_v11 = vpack.c.bf16 %v350_v5, %v349_v3  ;;  %v836_v12 = vpack.c.bf16 %v336_v7, %v335_v6  ;;  %v319_v13 = vld [vmem:[#allocation7 + $0x30] sm:$0xff]  ;;  %v337_v18 = vld [vmem:[#allocation7 + $0xc0] sm:$0xff]  ;;  %v1051_v5 = vmov 0.0|0.0   ;;  %v147_v6 = vlaneseq }
  0x6a   :  { %v320_v14 = vld [vmem:[#allocation7 + $0x38] sm:$0xff]  ;;  %v351_v15 = vld [vmem:[#allocation7 + $0x130] sm:$0xff]  ;;  %v868_v16 = vpack.c.bf16 %v368_v9, %v367_v8  ;;  %v338_v19 = vld [vmem:[#allocation7 + $0xc8] sm:$0xff] }
  0x6b   :  { %791 = vmatpush1.bf16.msra.mxu0 %v790_v36  ;;  %v352_v17 = vld [vmem:[#allocation7 + $0x138] sm:$0xff]  ;;  %v369_v20 = vld [vmem:[#allocation7 + $0x1c0] sm:$0xff]  ;;  %v370_v21 = vld [vmem:[#allocation7 + $0x1c8] sm:$0xff]  ;;  %v838_v22 = vpack.c.bf16 %v320_v14, %v319_v13  ;;  %v840_v24 = vpack.c.bf16 %v338_v19, %v337_v18  ;;  %v148_v7 = vshrl.u32 %v147_v6, 7 }
  0x6c   :  { %823 = vmatpush1.bf16.msra.mxu1 %v822_v37  ;;  %825 = vmatprep.subr.bf16.mxu0 %v824_v38  ;;  %v870_v23 = vpack.c.bf16 %v352_v17, %v351_v15  ;;  %v321_v25 = vld [vmem:[#allocation7 + $0x40] sm:$0xff]  ;;  %v322_v26 = vld [vmem:[#allocation7 + $0x48] sm:$0xff]  ;;  %v872_v28 = vpack.c.bf16 %v370_v21, %v369_v20  ;;  %v339_v30 = vld [vmem:[#allocation7 + $0xd0] sm:$0xff] }
  0x6d   :  { %857 = vmatprep.subr.bf16.mxu1 %v856_v42  ;;  %v353_v27 = vld [vmem:[#allocation7 + $0x140] sm:$0xff]  ;;  %v354_v29 = vld [vmem:[#allocation7 + $0x148] sm:$0xff]  ;;  %v340_v31 = vld [vmem:[#allocation7 + $0xd8] sm:$0xff]  ;;  %v842_v34 = vpack.c.bf16 %v322_v26, %v321_v25  ;;  %v149_v8 = vsub.s32 0, %v148_v7 }
  0x6e   :  { %232 = vmatmul.mubr.f32.vlgmr.msra.gmra.mrb[0].mxu0 %v80_v48  ;;  %v371_v32 = vld [vmem:[#allocation7 + $0x1d0] sm:$0xff]  ;;  %v372_v33 = vld [vmem:[#allocation7 + $0x1d8] sm:$0xff]  ;;  %v874_v35 = vpack.c.bf16 %v354_v29, %v353_v27  ;;  %v844_v36 = vpack.c.bf16 %v340_v31, %v339_v30  ;;  %v341_v42 = vld [vmem:[#allocation7 + $0xe0] sm:$0xff] }
  0x6f   :  { %303 = vmatmul.mubr.f32.vlgmr.msra.gmra.mrb[0].mxu1 %v80_v48  ;;  %827 = vmatpush3.bf16.msra.mxu0 %v826_v49  ;;  %v323_v37 = vld [vmem:[#allocation7 + $0x50] sm:$0xff]  ;;  %v324_v38 = vld [vmem:[#allocation7 + $0x58] sm:$0xff]  ;;  %v876_v40 = vpack.c.bf16 %v372_v33, %v371_v32  ;;  %v342_v43 = vld [vmem:[#allocation7 + $0xe8] sm:$0xff] }
  0x70   :  { %859 = vmatpush3.bf16.msra.mxu1 %v858_v50  ;;  %829 = vmatprep.subr.bf16.mxu0 %v828_v51  ;;  %v355_v39 = vld [vmem:[#allocation7 + $0x150] sm:$0xff]  ;;  %v356_v41 = vld [vmem:[#allocation7 + $0x158] sm:$0xff]  ;;  %v373_v44 = vld [vmem:[#allocation7 + $0x1e0] sm:$0xff]  ;;  %v846_v46 = vpack.c.bf16 %v324_v38, %v323_v37  ;;  %v848_v48 = vpack.c.bf16 %v342_v43, %v341_v42 }
  0x71   :  { %861 = vmatprep.subr.bf16.mxu1 %v860_v55  ;;  %v374_v45 = vld [vmem:[#allocation7 + $0x1e8] sm:$0xff]  ;;  %v878_v47 = vpack.c.bf16 %v356_v41, %v355_v39  ;;  %v325_v50 = vld [vmem:[#allocation7 + $0x60] sm:$0xff]  ;;  %v343_v56 = vld [vmem:[#allocation7 + $0xf0] sm:$0xff] }
  0x72   :  { %v880_v49 = vpack.c.bf16 %v374_v45, %v373_v44  ;;  %v326_v51 = vld [vmem:[#allocation7 + $0x68] sm:$0xff]  ;;  %v357_v52 = vld [vmem:[#allocation7 + $0x160] sm:$0xff]  ;;  %v344_v57 = vld [vmem:[#allocation7 + $0xf8] sm:$0xff] }
  0x73   :  { %831 = vmatpush3.bf16.msra.mxu0 %v830_v61  ;;  %v850_v53 = vpack.c.bf16 %v326_v51, %v325_v50  ;;  %v358_v54 = vld [vmem:[#allocation7 + $0x168] sm:$0xff]  ;;  %v375_v58 = vld [vmem:[#allocation7 + $0x1f0] sm:$0xff]  ;;  %v852_v59 = vpack.c.bf16 %v344_v57, %v343_v56  ;;  %v376_v60 = vld [vmem:[#allocation7 + $0x1f8] sm:$0xff] }
  0x74   :  { %863 = vmatpush3.bf16.msra.mxu1 %v862_v62  ;;  %833 = vmatprep.subr.bf16.mxu0 %v832_v63  ;;  %v882_v55 = vpack.c.bf16 %v358_v54, %v357_v52  ;;  %v327_v61 = vld [vmem:[#allocation7 + $0x70] sm:$0xff]  ;;  %v328_v62 = vld [vmem:[#allocation7 + $0x78] sm:$0xff]  ;;  %v884_v63 = vpack.c.bf16 %v376_v60, %v375_v58  ;;  %v525_v21 = vld [vmem:[#allocation8] sm:$0xff] }
  0x75   :  { %865 = vmatprep.subr.bf16.mxu1 %v864_v4  ;;  %v854_v1 = vpack.c.bf16 %v328_v62, %v327_v61  ;;  %v359_v2 = vld [vmem:[#allocation7 + $0x170] sm:$0xff]  ;;  %v360_v3 = vld [vmem:[#allocation7 + $0x178] sm:$0xff]  ;;  %v533_v41 = vld [vmem:[#allocation8 + $0x40] sm:$0xff] }
  0x76   :  { %v886_v4 = vpack.c.bf16 %v360_v3, %v359_v2  ;;  %v145_v9 = vld [vmem:[%s1168_s2] sm:$0xf]  ;;  %v527_v32 = vld [vmem:[#allocation8 + $0x10] sm:$0xff]  ;;  %v534_v42 = vld [vmem:[#allocation8 + $0x48] sm:$0xff] }
  0x77   :  { %835 = vmatpush3.bf16.msra.mxu0 %v834_v10  ;;  %v157_v10 = vsub.s32 2, %v148_v7  ;;  %v150_v13 = vrot.slane %v145_v9, %v149_v8  ;;  %v528_v33 = vld [vmem:[#allocation8 + $0x18] sm:$0xff]  ;;  %v531_v38 = vld [vmem:[#allocation8 + $0x30] sm:$0xff]  ;;  %v901_v43 = vpack.c.bf16 %v534_v42, %v533_v41 }
  0x78   :  { %867 = vmatpush3.bf16.msra.mxu1 %v866_v11  ;;  %837 = vmatprep.subr.bf16.mxu0 %v836_v12  ;;  %v153_v11 = vsub.s32 1, %v148_v7  ;;  %v161_v12 = vsub.s32 3, %v148_v7  ;;  %v532_v39 = vld [vmem:[#allocation8 + $0x38] sm:$0xff]  ;;  %v535_v44 = vld [vmem:[#allocation8 + $0x50] sm:$0xff] }
  0x79   :  { %869 = vmatprep.subr.bf16.mxu1 %v868_v16  ;;  %v158_v14 = vrot.slane %v145_v9, %v157_v10  ;;  %v536_v45 = vld [vmem:[#allocation8 + $0x58] sm:$0xff]  ;;  %v539_v50 = vld [vmem:[#allocation8 + $0x70] sm:$0xff] }
  0x7a   :  { %v154_v15 = vrot.slane %v145_v9, %v153_v11  ;;  %v162_v16 = vrot.slane %v145_v9, %v161_v12  ;;  %v540_v51 = vld [vmem:[#allocation8 + $0x78] sm:$0xff] }
  0x7b   :  { %839 = vmatpush3.bf16.msra.mxu0 %v838_v22  ;;  %v526_v22 = vld [vmem:[#allocation8 + $0x8] sm:$0xff]  ;;  %v910_v52 = vpack.c.bf16 %v540_v51, %v539_v50 }
  0x7c   :  { %871 = vmatpush3.bf16.msra.mxu1 %v870_v23  ;;  %841 = vmatprep.subr.bf16.mxu0 %v840_v24  ;;  %v889_v29 = vpack.c.bf16 %v526_v22, %v525_v21 }
  0x7d   :  { %873 = vmatprep.subr.bf16.mxu1 %v872_v28 }
  0x7f   :  { %843 = vmatpush3.bf16.msra.mxu0 %v842_v34  ;;  %v892_v34 = vpack.c.bf16 %v528_v33, %v527_v32 }
  0x80   :  { %875 = vmatpush3.bf16.msra.mxu1 %v874_v35  ;;  %845 = vmatprep.subr.bf16.mxu0 %v844_v36  ;;  %v529_v35 = vld [vmem:[#allocation8 + $0x20] sm:$0xff]  ;;  %v530_v36 = vld [vmem:[#allocation8 + $0x28] sm:$0xff] }
  0x81   :  { %877 = vmatprep.subr.bf16.mxu1 %v876_v40  ;;  %v895_v37 = vpack.c.bf16 %v530_v36, %v529_v35  ;;  %v898_v40 = vpack.c.bf16 %v532_v39, %v531_v38 }
  0x83   :  { %847 = vmatpush3.bf16.msra.mxu0 %v846_v46  ;;  %v904_v46 = vpack.c.bf16 %v536_v45, %v535_v44 }
  0x84   :  { %879 = vmatpush3.bf16.msra.mxu1 %v878_v47  ;;  %849 = vmatprep.subr.bf16.mxu0 %v848_v48  ;;  %v537_v47 = vld [vmem:[#allocation8 + $0x60] sm:$0xff]  ;;  %v538_v48 = vld [vmem:[#allocation8 + $0x68] sm:$0xff] }
  0x85   :  { %881 = vmatprep.subr.bf16.mxu1 %v880_v49  ;;  %v907_v49 = vpack.c.bf16 %v538_v48, %v537_v47 }
  0x87   :  { %851 = vmatpush3.bf16.msra.mxu0 %v850_v53 }
  0x88   :  { %883 = vmatpush3.bf16.msra.mxu1 %v882_v55  ;;  %853 = vmatprep.subr.bf16.mxu0 %v852_v59  ;;  %v636_v55 = vld [vmem:[%s1170_s4] ss:$0 sm:$0xff]  ;;  %s1012_s4 = scalar_lea.vmem %s626_s8, 128 }
  0x89   :  { %885 = vmatprep.subr.bf16.mxu1 %v884_v63  ;;  %v637_v63 = vld [vmem:[%s1172_s6] ss:$0 sm:$0xff]  ;;  %p1013_p4 = scmp.ne.s32.totalorder %s626_s8, %s1012_s4  ;;  %p1018_p6 = scmp.lt.s32.totalorder %s1012_s4, %s1012_s4 }
  0x8b   :  { %855 = vmatpush3.bf16.msra.mxu0 %v854_v1  ;;  %p1019_p7 = por %p1018_p6, %p1017_p5 }
  0x8c   :  { %887 = vmatpush3.bf16.msra.mxu1 %v886_v4  ;;  %888 = vmatprep.subr.bf16.mxu0 %v1051_v5 }
  0x8d   :  { %p1020_p8 = pnand %p1019_p7, %p1013_p4 }
 0x141   :  { %v233_v17 = vpop.f32.mrb[0].mxu0 }
 0x142   :  { %v234_v18 = vadd.f32 %v233_v17, %v150_v13  ;;  %v304_v19 = vpop.f32.mrb[0].mxu1  ;;  %v235_v20 = vpop.f32.mrb[1].mxu0 }
 0x143   :  { %v305_v23 = vadd.f32 %v304_v19, %v158_v14  ;;  %v236_v24 = vadd.f32 %v235_v20, %v154_v15  ;;  %v306_v25 = vpop.f32.mrb[1].mxu1 }
 0x144   :  { %v307_v26 = vadd.f32 %v306_v25, %v162_v16  ;;  %v309_v30 = vmax.f32 %v234_v18, 0.0 }
 0x145   :  { %v311_v27 = vmax.f32 %v305_v23, 0.0  ;;  %v310_v28 = vmax.f32 %v236_v24, 0.0 }
 0x146   :  { %v312_v31 = vmax.f32 %v307_v26, 0.0 }
 0x147   :  { %448 = vmatprep.mubr.f32.mxu0 %v310_v28 }
 0x148   :  { %518 = vmatprep.mubr.f32.mxu1 %v312_v31  ;;  %449 = vmatmul.mubr.f32.vlgmr.msra.gmra.mrb[2].mxu0 %v309_v30 }
 0x149   :  { %519 = vmatmul.mubr.f32.vlgmr.msra.gmra.mrb[2].mxu1 %v311_v27  ;;  %890 = vmatpush3.bf16.msra.mxu0 %v889_v29 }
 0x14a   :  { %891 = vmatprep.subr.bf16.mxu0 %v1051_v5  ;;  %757 = vmatprep.mubr.msk.f32.mxu0 %vm1052_vm0, %v1050_v0 }
 0x14d   :  { %893 = vmatpush3.bf16.msra.mxu0 %v892_v34 }
 0x14e   :  { %894 = vmatprep.subr.bf16.mxu0 %v1051_v5 }
 0x151   :  { %896 = vmatpush3.bf16.msra.mxu0 %v895_v37 }
 0x152   :  { %897 = vmatprep.subr.bf16.mxu0 %v1051_v5 }
 0x155   :  { %899 = vmatpush3.bf16.msra.mxu0 %v898_v40 }
 0x156   :  { %900 = vmatprep.subr.bf16.mxu0 %v1051_v5 }
 0x159   :  { %902 = vmatpush3.bf16.msra.mxu0 %v901_v43 }
 0x15a   :  { %903 = vmatprep.subr.bf16.mxu0 %v1051_v5 }
 0x15d   :  { %905 = vmatpush3.bf16.msra.mxu0 %v904_v46 }
 0x15e   :  { %906 = vmatprep.subr.bf16.mxu0 %v1051_v5 }
 0x161   :  { %908 = vmatpush3.bf16.msra.mxu0 %v907_v49 }
 0x162   :  { %909 = vmatprep.subr.bf16.mxu0 %v1051_v5 }
 0x165   :  { %911 = vmatpush3.bf16.msra.mxu0 %v910_v52 }
 0x21b   :  { %v670_v53 = vpop.f32.mrb[2].mxu0 }
 0x21c   :  { %v705_v54 = vpop.f32.mrb[2].mxu1  ;;  %v671_v56 = vpop.f32.mrb[3].mxu0 }
 0x21d   :  { %v672_v57 = vadd.f32 %v671_v56, %v670_v53  ;;  %v706_v58 = vpop.f32.mrb[3].mxu1 }
 0x21e   :  { %v707_v59 = vadd.f32 %v706_v58, %v705_v54 }
 0x21f   :  { %v451_v60 = vadd.f32 %v672_v57, %v636_v55 }
 0x221   :  { %v521_v61 = vadd.f32 %v707_v59, %v451_v60 }
 0x223   :  { %v524_v62 = vmax.f32 %v521_v61, 0.0 }
 0x225   :  { %758 = vmatmul.mubr.f32.vlgmr.msra.gmra.mrb[4].mxu0 %v524_v62 }
 0x2f8   :  { %v614_v0 = vpop.f32.mrb[4].mxu0 }
 0x2f9   :  { %v615_v1 = vadd.f32 %v637_v63, %v614_v0  ;;  %v759_v2 = vpop.f32.mrb[5].mxu0 }
 0x2fb   :  { %618 = vst [vmem:[#allocation10] sm:$0xff] %v615_v1 }
 0x2fc   :  { %1023 = shalt.err (!%p1020_p8)
}
 0x2fd   :  { %s1024_s11 = scalar_lea.hbm %s1173_s7, 128 }
 0x2fe   :  { %p1025_p9 = scmp.ne.s32.totalorder %s1173_s7, %s1024_s11  ;;  %p1028_p10 = scmp.lt.u32.totalorder %s1024_s11, %s1173_s7 }
 0x300   :  { %p1030_p11 = pnand %p1028_p10, %p1025_p9 }
 0x302   :  { %1033 = shalt.err (!%p1030_p11)
}
 0x303   :  { %628 = dma.vmem_to_hbm [thread:$0]  %s626_s8, 128, %s1173_s7, [#allocation4]  }
 0x304   :  { %1040 = dma.done.wait [#allocation4], 128  }
 0x305   :  { %1041 = vsyncadd [#allocation4], 4294967168 }
 0x306   :  { %632 = vsyncpa [#allocation3], 1 }
 0x307   :  { %633 = vsyncpa [#allocation6], 1 }
 0x308   :  { %634 = vsyncpa [#allocation9], 1 }
 0x309   :  { %635 = vsyncpa [#allocation4], 1 }

</bundles_post_ra>
